<compile_context>
chip_gen: v7x
topology: tpu7x:2x2x1
jax: 0.10.0
libtpu: 0.0.40
codegen_flags: <defaults>
</compile_context>

<pallas_src>
import jax
import jax.numpy as jnp
from jax.experimental import pallas as pl
from jax.experimental.pallas import tpu as pltpu

_LANES = 128
# 8192 x 128 f32 = 4 MiB per output tile; double-buffered -> 8 MiB of VMEM,
# within the scoped-VMEM defaults of v5e (16 MiB), v6e/v7x (32 MiB).
_MAX_TILE_ROWS = 8192


def _fill_kernel(p_ref, o_ref):
    # p_ref: (1,) f32 raw learned parameter in SMEM (no HBM->VMEM DMA at all).
    # Compute exp/clip on one 128-lane vector row (EUP exp is essentially free
    # against the store stream; avoids relying on scalar-core transcendentals),
    # then sublane-broadcast it over the whole tile: a pure vst stream.
    row = jnp.full((1, _LANES), p_ref[0] * 10.0, jnp.float32)
    row = jnp.clip(jnp.exp(row), 1e-6, 1e6).astype(o_ref.dtype)
    o_ref[...] = jnp.broadcast_to(row, o_ref.shape)


def _round_up(a, b):
    return ((a + b - 1) // b) * b


def learned_variance_forward(x, inv_std_param):
    """x: any-shaped float array (only shape/dtype used);
    inv_std_param: shape (1,) float32 learned parameter (_inv_std)."""
    n = x.size
    # Pad only to a lane multiple (128). The (8,128) constraint applies to the
    # block_shape (tile_rows below is either the full extent or a multiple of
    # 8); Pallas masks a partial edge block along the row axis automatically.
    n_pad = _round_up(n, _LANES)
    rows = n_pad // _LANES

    if rows <= _MAX_TILE_ROWS:
        if rows > 4096 and rows % 16 == 0:
            # Split a large single tile in two so both v7x TensorCores write HBM.
            tile_rows = rows // 2
        else:
            tile_rows = rows              # full-extent block: always legal
    else:
        tile_rows = _MAX_TILE_ROWS        # multiple of 8; edge block is masked

    grid = (pl.cdiv(rows, tile_rows),)

    out2d = pl.pallas_call(
        _fill_kernel,
        out_shape=jax.ShapeDtypeStruct((rows, _LANES), x.dtype),
        grid=grid,
        in_specs=[
            # Raw scalar parameter: untiled, lives in SMEM.
            pl.BlockSpec(memory_space=pltpu.MemorySpace.SMEM),
        ],
        out_specs=pl.BlockSpec((tile_rows, _LANES), lambda i: (i, 0)),
        compiler_params=pltpu.CompilerParams(
            dimension_semantics=("parallel",),
        ),
    )(inv_std_param.reshape((1,)).astype(jnp.float32))

    if n_pad == n:
        # Common case (n % 128 == 0): pure metadata reshape, no extra HBM pass.
        return out2d.reshape(x.shape)
    # TODO(synk): padding fallback re-reads/writes the output once; only hit
    # when x.size % 128 != 0 (rare for NN tensors).
    return out2d.reshape(-1)[:n].reshape(x.shape)


if __name__ == "__main__":
    key = jax.random.PRNGKey(0)

    # Deterministic parameter init, matching nn.Parameter(torch.tensor(init_val)).
    init_val = 0.3
    inv_std_param = jnp.array([init_val], dtype=jnp.float32)

    # Example "sdf" input, small NCHW-like shape (2*4*16*16 = 2048 = 16x128).
    x = jax.random.normal(key, (2, 4, 16, 16), dtype=jnp.float32)

    out = learned_variance_forward(x, inv_std_param)
    out = jax.block_until_ready(out)

    # Reference check (plain JAX).
    ref = jnp.ones_like(x) * jnp.clip(jnp.exp(inv_std_param[0] * 10.0), 1e-6, 1e6)
    assert out.shape == x.shape and out.dtype == x.dtype
    assert jnp.allclose(out, ref, rtol=1e-6, atol=1e-6)

    print("KERNEL_OK")
</pallas_src>

<mosaic_0001>
module attributes {stable_mosaic.version = 11 : i64} {
  func.func @_fill_kernel(%arg0: i32, %arg1: memref<1xf32, #tpu.memory_space<smem>>, %arg2: memref<16x128xf32, #tpu.memory_space<vmem>>) attributes {dimension_semantics = [#tpu.dimension_semantics<parallel>], iteration_bounds = array<i64: 1>, scalar_prefetch = 0 : i64, scratch_operands = 0 : i64, tpu.core_type = #tpu.core_type<tc>, window_params = [{transform_indices = @transform_0, window_bounds = array<i64: 1>}, {transform_indices = @transform_1, window_bounds = array<i64: 16, 128>}]} {
    %c0 = arith.constant 0 : index
    %0 = memref.load %arg1[%c0] : memref<1xf32, #tpu.memory_space<smem>>
    %cst = arith.constant 1.000000e+01 : f32
    %1 = arith.mulf %0, %cst : f32
    %2 = vector.broadcast %1 : f32 to vector<1x128xf32>
    %3 = math.exp %2 : vector<1x128xf32>
    %cst_0 = arith.constant 9.99999997E-7 : f32
    %cst_1 = arith.constant 1.000000e+06 : f32
    %4 = vector.broadcast %cst_0 : f32 to vector<1x128xf32>
    %5 = arith.maximumf %4, %3 : vector<1x128xf32>
    %6 = vector.broadcast %cst_1 : f32 to vector<1x128xf32>
    %7 = arith.minimumf %6, %5 : vector<1x128xf32>
    %8 = vector.shape_cast %7 : vector<1x128xf32> to vector<1x128xf32>
    %9 = vector.broadcast %8 : vector<1x128xf32> to vector<16x128xf32>
    %c0_2 = arith.constant 0 : index
    %c0_3 = arith.constant 0 : index
    %10 = vector.load %arg2[%c0_2, %c0_3] : memref<16x128xf32, #tpu.memory_space<vmem>>, vector<16x128xf32>
    tpu.vector_store %arg2[%c0_2, %c0_3], %9 {strides = array<i32>} : memref<16x128xf32, #tpu.memory_space<vmem>>, vector<16x128xf32>,
    return
  }
  func.func @transform_0(%arg0: i32) -> i32 {
    %c0_i32 = arith.constant 0 : i32
    %c0_i32_0 = arith.constant 0 : i32
    return %c0_i32 : i32
  }
  func.func @transform_1(%arg0: i32) -> (i32, i32) {
    %c0_i32 = arith.constant 0 : i32
    %c0_i32_0 = arith.constant 0 : i32
    return %arg0, %c0_i32 : i32, i32
  }
}

</mosaic_0001>

<bundles_post_ra>
// kernel: tpu_custom_call.1
= control target key start
LH: loop header
LB: loop body
LE: loop exit
PB: predicated region body
PF: predicated region fallthrough
CT: control target
= control target key end

     0   :  { %s92_s0 = inlined_call_operand.<no memory space> [shape: f32[1], index: 0, kind: input, shape index: {}]   ;;  %s93_s1 = inlined_call_operand.hbm [shape: f32[16,128], index: 1, kind: output, shape index: {}]  }
   0x1   :  { %s11_s8 = smul.f32 10.0, %s92_s0 }
   0x2   :  { %7 = vsyncpa [#allocation4], 0  ;;  %s64_s9 = smov [#allocation3]  }
   0x3   :  { %v12_v0 = vstv %s11_s8  ;;  %s24_s10 = sshll.u32 %s64_s9, 4  ;;  %s25_s10 = int_to_ptr.vmem [resolvable:$true] %s24_s10 }
   0x4   :  { %v13_v1 = vmul.f32 1.442695, %v12_v0  ;;  %s40_s11 = scalar_lea.vmem %s25_s10, 256  ;;  %p45_p1 = scmp.lt.s32.totalorder %s25_s10, %s25_s10 }
   0x5   :  { %p41_p0 = scmp.ne.s32.totalorder %s25_s10, %s40_s11  ;;  %p46_p2 = scmp.lt.s32.totalorder %s40_s11, %s40_s11 }
   0x6   :  { %38 = vpow2.f32 %v13_v1 }
   0x7   :  { %p47_p3 = por %p46_p2, %p45_p1 }
   0x9   :  { %p48_p4 = pnand %p47_p3, %p41_p0 }
  0x10   :  { %v39_v2 = vpop.eup %38 }
  0x11   :  { %v15_v3 = vmax.f32 %v39_v2, 1e-06 }
  0x13   :  { %v16_v4 = vmin.f32 %v15_v3, 1000000.0 }
  0x15   :  { %17 = vst [vmem:[#allocation3] sm:$0xff] %v16_v4  ;;  %18 = vst [vmem:[#allocation3 + $0x8] sm:$0xff] %v16_v4 }
  0x16   :  { %51 = shalt.err (!%p48_p4)
}
  0x17   :  { %s52_s13 = scalar_lea.hbm %s93_s1, 256 }
  0x18   :  { %p53_p5 = scmp.ne.s32.totalorder %s93_s1, %s52_s13  ;;  %p56_p6 = scmp.lt.u32.totalorder %s52_s13, %s93_s1 }
  0x1a   :  { %p58_p7 = pnand %p56_p6, %p53_p5 }
  0x1c   :  { %61 = shalt.err (!%p58_p7)
}
  0x1d   :  { %s65_s18 = smov 128   ;;  %s66_s19 = smov 8  }
  0x1e   :  { %30 = dma.vmem_to_hbm [thread:$0]  %s25_s10, 256, %s93_s1, [#allocation4], %s65_s18, %s65_s18, %s66_s19  }
  0x1f   :  { %62 = dma.done.wait [#allocation4], 256  }
  0x20   :  { %63 = vsyncadd [#allocation4], 4294967040 }
  0x21   :  { %34 = vsyncpa [#allocation4], 1 }

</bundles_post_ra>
